<compile_context>
chip_gen: v6e
topology: v6e:2x2x1
jax: 0.10.0
libtpu: 0.0.40
codegen_flags: <defaults>
</compile_context>

<pallas_src>
import jax
import jax.numpy as jnp
from jax.experimental import pallas as pl
from jax.experimental.pallas import tpu as pltpu


_TS_MAX = 1024          # tile along S (the OUTPUT's lane/last dim) — big & 128-aligned
_TD_MAX = 512           # tile along D (the output's sublane dim)
_SMALL_BYTES = 1 << 20  # below ~1 MiB, let XLA handle the transpose


def _permute_021_kernel(x_ref, o_ref):
    # x_ref: (ts, td) VMEM tile of (S, D); o_ref: (td, ts) VMEM tile of (D, S).
    # 2-D lane/sublane transpose -> XLU vxpose.  swapaxes(-2, -1) instead of .T
    # so the kernel stays correct even if the batch squeeze is ever removed.
    o_ref[...] = jnp.swapaxes(x_ref[...], -2, -1)


def _pick_tile(dim: int, max_tile: int) -> int:
    # Fixed 128-aligned tile (max_tile is a multiple of 128); ragged edge
    # blocks are masked by Pallas.  Full extent (always a legal block) when
    # the dim is smaller than the tile budget.
    return dim if dim <= max_tile else max_tile


def permute_021(x):
    """(B, S, D) -> (B, D, S) via a tiled Pallas transpose."""
    B, S, D = x.shape
    itemsize = jnp.dtype(x.dtype).itemsize

    # Small / narrow tensors: sub-128 output lanes force masked vst.msk stores
    # and the pallas_call launch + per-step overhead dominates.  XLA wins there.
    if min(S, D) < 128 or B * S * D * itemsize < _SMALL_BYTES:
        return jnp.transpose(x, (0, 2, 1))

    ts = _pick_tile(S, _TS_MAX)
    td = _pick_tile(D, _TD_MAX)

    # Innermost grid axis advances the output's last (S) dim so consecutive
    # steps write adjacent contiguous regions of the (B, D, S) output
    # (streaming HBM writes; reads become the strided side).
    grid = (B, pl.cdiv(D, td), pl.cdiv(S, ts))

    cost = pl.CostEstimate(
        flops=0,
        transcendentals=0,
        bytes_accessed=2 * B * S * D * itemsize,  # full read + full write
    )

    return pl.pallas_call(
        _permute_021_kernel,
        out_shape=jax.ShapeDtypeStruct((B, D, S), x.dtype),
        grid=grid,
        in_specs=[
            # Batch dim squeezed (None) -> kernel sees a clean 2-D (ts, td) tile.
            pl.BlockSpec((None, ts, td), lambda b, d, s: (b, s, d)),
        ],
        out_specs=pl.BlockSpec((None, td, ts), lambda b, d, s: (b, d, s)),
        compiler_params=pltpu.CompilerParams(
            # Every grid point writes a distinct output block -> fully parallel.
            dimension_semantics=("parallel", "parallel", "parallel"),
            # ~8 MiB double-buffered at the chosen f32 tiles; 32 MiB gives
            # headroom everywhere (v5e scoped default is only 16 MiB).
            vmem_limit_bytes=32 * 1024 * 1024,
        ),
        cost_estimate=cost,
    )(x)


class Permute:
    """JAX/Pallas counterpart of the PyTorch Permute module."""

    def __init__(self, *dims):
        self.dims = dims

    def __call__(self, x):
        # NOTE(perf): if this permute feeds a matmul/linear, prefer folding the
        # axis swap into the consumer's dot_general dimension_numbers instead
        # of materializing (B, D, S) in HBM — that makes the transpose free.
        if self.dims == (0, 2, 1) and x.ndim == 3:
            return permute_021(x)
        # Other permutations: pure layout op, let XLA handle it.
        return jnp.transpose(x, self.dims)


if __name__ == "__main__":
    key = jax.random.PRNGKey(0)
    perm = Permute(0, 2, 1)

    # 1) Small shape consistent with the module's use (batch, seq, hidden).
    #    Hits the jnp.transpose fast path (narrow / tiny tensor).
    B, S, D = 2, 8, 32
    x = jax.random.normal(key, (B, S, D), dtype=jnp.float32)
    y = jax.block_until_ready(perm(x))
    y_ref = jnp.transpose(x, (0, 2, 1))
    assert y.shape == (B, D, S), y.shape
    assert jnp.array_equal(y, y_ref), "permute mismatch (small fallback)"

    # 2) 128-aligned shape that exercises the Pallas path with full-lane stores.
    k2 = jax.random.PRNGKey(0)
    B2, S2, D2 = 2, 256, 512
    x2 = jax.random.normal(k2, (B2, S2, D2), dtype=jnp.float32)
    y2 = jax.block_until_ready(perm(x2))
    y2_ref = jnp.transpose(x2, (0, 2, 1))
    assert y2.shape == (B2, D2, S2), y2.shape
    assert jnp.array_equal(y2, y2_ref), "Pallas permute mismatch (aligned)"

    # 3) Non-128-multiple dims exceeding one tile: exercises the cdiv grid and
    #    masked edge blocks on both tiled axes.
    k3 = jax.random.PRNGKey(0)
    B3, S3, D3 = 1, 1100, 640
    x3 = jax.random.normal(k3, (B3, S3, D3), dtype=jnp.float32)
    y3 = jax.block_until_ready(perm(x3))
    y3_ref = jnp.transpose(x3, (0, 2, 1))
    assert y3.shape == (B3, D3, S3), y3.shape
    assert jnp.array_equal(y3, y3_ref), "Pallas permute mismatch (ragged edges)"

    print("KERNEL_OK")
</pallas_src>

<mosaic_0001>
module attributes {stable_mosaic.version = 11 : i64} {
  func.func @_permute_021_kernel(%arg0: i32, %arg1: i32, %arg2: i32, %arg3: memref<1x256x512xf32, #tpu.memory_space<vmem>>, %arg4: memref<1x512x256xf32, #tpu.memory_space<vmem>>) attributes {dimension_semantics = [#tpu.dimension_semantics<parallel>, #tpu.dimension_semantics<parallel>, #tpu.dimension_semantics<parallel>], iteration_bounds = array<i64: 2, 1, 1>, scalar_prefetch = 0 : i64, scratch_operands = 0 : i64, tpu.core_type = #tpu.core_type<tc>, window_params = [{transform_indices = @transform_0, window_bounds = array<i64: 1, 256, 512>}, {transform_indices = @transform_1, window_bounds = array<i64: 1, 512, 256>}]} {
    %c0 = arith.constant 0 : index
    %c0_0 = arith.constant 0 : index
    %c0_1 = arith.constant 0 : index
    %0 = vector.load %arg3[%c0, %c0_0, %c0_1] : memref<1x256x512xf32, #tpu.memory_space<vmem>>, vector<1x256x512xf32>
    %1 = vector.shape_cast %0 : vector<1x256x512xf32> to vector<256x512xf32>
    %2 = tpu.transpose %1, [1, 0] : vector<256x512xf32> -> vector<512x256xf32>
    %c0_2 = arith.constant 0 : index
    %c0_3 = arith.constant 0 : index
    %c0_4 = arith.constant 0 : index
    %3 = vector.load %arg4[%c0_2, %c0_3, %c0_4] : memref<1x512x256xf32, #tpu.memory_space<vmem>>, vector<1x512x256xf32>
    %4 = vector.shape_cast %3 : vector<1x512x256xf32> to vector<512x256xf32>
    %5 = vector.shape_cast %2 : vector<512x256xf32> to vector<1x512x256xf32>
    tpu.vector_store %arg4[%c0_2, %c0_3, %c0_4], %5 {strides = array<i32>} : memref<1x512x256xf32, #tpu.memory_space<vmem>>, vector<1x512x256xf32>,
    return
  }
  func.func @transform_0(%arg0: i32, %arg1: i32, %arg2: i32) -> (i32, i32, i32) {
    %c0_i32 = arith.constant 0 : i32
    return %arg0, %arg2, %arg1 : i32, i32, i32
  }
  func.func @transform_1(%arg0: i32, %arg1: i32, %arg2: i32) -> (i32, i32, i32) {
    %c0_i32 = arith.constant 0 : i32
    return %arg0, %arg1, %arg2 : i32, i32, i32
  }
}

</mosaic_0001>

<bundles_post_ra>
// kernel: tpu_custom_call.1
= control target key start
LH: loop header
LB: loop body
LE: loop exit
PB: predicated region body
PF: predicated region fallthrough
CT: control target
= control target key end

     0   :  { %6 = vsyncpa [#allocation3], 0  ;;  %s1416_s0 = inlined_call_operand.hbm [shape: f32[2,256,512], index: 0, kind: input, shape index: {}]   ;;  %s1417_s1 = inlined_call_operand.hbm [shape: f32[2,512,256], index: 1, kind: output, shape index: {}]  }
   0x1   :  { %8 = vsyncpa [#allocation3 + $0x1], 0 }
   0x2   :  { %9 = vsyncpa [#allocation4], 0 }
   0x3   :  { %11 = vsyncpa [#allocation4 + $0x1], 0  ;;  %s1005_s6 = smov 0   ;;  %s1007_s7 = smov 0  }
   0x4   :  { %s1009_s8 = smov 0   ;;  %s1011_s9 = smov 0  }
   0x5   :  { %s1013_s10 = smov 0   ;;  %s1015_s11 = smov 0  }
   0x6 LB: > { %s796_s12 = sadd.s32 4294967295, %s987_s11   ;;  %s797_s13 = sadd.s32 4294967294, %s987_s11   ;;  %s987_s11 = sphi %s1015_s11, %s17_s11   ;;  %s983_s10 = sphi %s1013_s10, %s1428_s10   ;;  %s979_s9 = sphi %s1011_s9, %s1427_s9   ;;  %s975_s8 = sphi %s1009_s8, %s1426_s8   ;;  %s971_s7 = sphi %s1007_s7, %s1425_s7   ;;  %s967_s6 = sphi %s1005_s6, %s1424_s6  }
   0x7   : > { %s36_s14 = sadd.s32 1, %s983_s10  ;;  %s47_s15 = sadd.s32 1, %s975_s8 }
   0x8   : > { %p38_p0 = scmp.ge.s32.totalorder %s36_s14, 2  ;;  %p54_p1 = scmp.ne.s32.totalorder %s975_s8, %s971_s7 }
   0x9   : > { %p55_p2 = scmp.eq.s32.totalorder %s987_s11, 0  ;;  %p60_p3 = scmp.ne.s32.totalorder %s971_s7, %s967_s6 }
   0xa   : > { %s1430_s14 = smov (%p38_p0, %s36_s14), 0  ;;  %p61_p5 = scmp.eq.s32.totalorder %s796_s12, 0 }
   0xb   : > { %p1046_p4 = por %p55_p2, %p54_p1  ;;  %s40_s17 = ssub.s32 %s983_s10, %s1430_s14 }
   0xc   : > { %p88_p6 = scmp.eq.s32.totalorder %s796_s12, 1  ;;  %p45_p7 = scmp.eq.s32.totalorder %s40_s17, 0 }
   0xd   : > { %p1052_p8 = por %p61_p5, %p60_p3  ;;  %p94_p10 = scmp.eq.s32.totalorder %s797_s13, 1 }
   0xe   : > { %p1056_p9 = por %p88_p6, %p54_p1  ;;  %p825_p13 = scmp.lt.s32.totalorder %s987_s11, 2 }
   0xf   : > { %s1061_s20 = scalar_select %p45_p7, %s975_s8, %s47_s15  }
  0x10   : > { %p1063_p11 = por %p94_p10, %p60_p3  ;;  %s114_s22 = sand.u32 1, %s975_s8  }
  0x11   : > { %s800_s23 = sshll.u32 %s114_s22, 10  ;;  %s811_s24 = sshll.u32 %s983_s10, 14 }
  0x12   : > { %s129_s27 = scalar_lea.hbm %s1416_s0, %s811_s24  ;;  %s118_s28 = scalar_lea.vmem [#allocation2], %s800_s23 }
  0x13   : > { %s130_s29 = sshll.u32 %s118_s28, 4  ;;  %p1076_p0 = pnand %p825_p13, %p1046_p4  ;;  %s131_s29 = int_to_ptr.vmem [resolvable:$true] %s130_s29 }
  0x14   : > { %p803_p1 = scmp.ge.s32.totalorder %s987_s11, 1  ;;  %s115_s2 = scalar_lea.sflag [#allocation3], %s114_s22 }
  0x15   : > { %p881_p2 = pneg %p1076_p0  ;;  %s892_s3 = scalar_lea.vmem %s131_s29, 16384 }
  0x16   : > { %p893_p3 = scmp.ne.s32.totalorder %s131_s29, %s892_s3  ;;  %s989_s4 = smov [#allocation2]  }
  0x17   : > { %s897_s5 = sshll.u32 %s989_s4, 4  ;;  %s898_s5 = int_to_ptr.vmem [resolvable:$false] %s897_s5 }
  0x18   : > { %p895_p5 = pnand %p893_p3, %p881_p2  ;;  %s899_s12 = scalar_lea.vmem %s898_s5, 32768 }
  0x19   : > { %p900_p7 = scmp.lt.s32.totalorder %s131_s29, %s898_s5  ;;  %p901_p10 = scmp.lt.s32.totalorder %s899_s12, %s892_s3 }
  0x1a   : > { %p896_p6 = pneg %p895_p5 }
  0x1b   : > { %p902_p12 = por %p901_p10, %p900_p7 }
  0x1d   : > { %p903_p4 = pnand %p902_p12, %p896_p6 }
  0x1f   : > { %906 = shalt.err (!%p903_p4)
}
  0x20   : > { %s990_s13 = smov 512   ;;  %s991_s15 = smov 32  }
  0x21   : > { %820 = dma.hbm_to_vmem [thread:$0]  (!%p1076_p0), %s129_s27, 16384, %s131_s29, %s115_s2, %s990_s13, %s990_s13, %s991_s15  }
  0x22   : > { %p138_p13 = scmp.lt.s32.totalorder %s987_s11, 3 }
  0x24   : > { %p139_p2 = pnand %p803_p1, %p138_p13 }
  0x25   : > { %s1089_s16 = sand.u32 (!%p139_p2), 1, %s971_s7  }
  0x26   : > { %142 = sbr.rel (%p139_p2) target bundleno = 436 (0x1b4), region = 24  ;;  %s804_s17 = sshll.u32 (!%p139_p2), %s1089_s16, 10 }
  0x27   : > { %s145_s22 = scalar_lea.sflag (!%p139_p2), [#allocation3], %s1089_s16  ;;  %s1095_s23 = scalar_lea.vmem (!%p139_p2), [#allocation2], %s804_s17 }
  0x2b   : > { %958 = dma.done.wait (%p1052_p8), %s145_s22, 16384  }
  0x2c   : > { %960 = vsyncadd (%p1052_p8), %s145_s22, 4294950912  ;;  %v172_v0 = vld [vmem:[%s1095_s23 + $0x8] sm:$0xff]  ;;  %v171_v1 = vld [vmem:[%s1095_s23] sm:$0xff]  ;;  %s1167_s18 = scalar_lea.vmem [#allocation5], %s804_s17  ;;  %s812_s24 = sshll.u32 %s979_s9, 14 }
  0x2d   : > { %331 = vxpose.xlu1.b32.start [1/16] %v172_v0, 128  ;;  %299 = vxpose.xlu0.b32.start [1/16] %v171_v1, 128  ;;  %v176_v2 = vld [vmem:[%s1095_s23 + $0x28] sm:$0xff]  ;;  %v175_v3 = vld [vmem:[%s1095_s23 + $0x20] sm:$0xff]  ;;  %v174_v32 = vld [vmem:[%s1095_s23 + $0x18] sm:$0xff]  ;;  %s702_s25 = sshll.u32 %s1167_s18, 4  ;;  %s1364_s28 = scalar_lea.hbm %s1417_s1, %s812_s24  ;;  %s1366_s25 = int_to_ptr.vmem [resolvable:$true] %s702_s25 }
  0x2e   : > { %v180_v4 = vld [vmem:[%s1095_s23 + $0x48] sm:$0xff]  ;;  %v179_v5 = vld [vmem:[%s1095_s23 + $0x40] sm:$0xff]  ;;  %v173_v33 = vld [vmem:[%s1095_s23 + $0x10] sm:$0xff]  ;;  %s684_s9 = scalar_lea.sflag [#allocation4], %s1089_s16  ;;  %s907_s29 = scalar_lea.vmem %s1366_s25, 16384 }
  0x2f   : > { %v184_v6 = vld [vmem:[%s1095_s23 + $0x68] sm:$0xff]  ;;  %v183_v7 = vld [vmem:[%s1095_s23 + $0x60] sm:$0xff]  ;;  %v178_v34 = vld [vmem:[%s1095_s23 + $0x38] sm:$0xff]  ;;  %p908_p8 = scmp.ne.s32.totalorder %s1366_s25, %s907_s29  ;;  %s992_s30 = smov [#allocation5]  }
  0x30   : > { %v188_v8 = vld [vmem:[%s1095_s23 + $0x88] sm:$0xff]  ;;  %v187_v9 = vld [vmem:[%s1095_s23 + $0x80] sm:$0xff]  ;;  %v177_v35 = vld [vmem:[%s1095_s23 + $0x30] sm:$0xff]  ;;  %s911_s2 = sshll.u32 %s992_s30, 4  ;;  %s912_s2 = int_to_ptr.vmem [resolvable:$false] %s911_s2 }
  0x31   : > { %332 = vxpose.xlu1.b32.cont [2/16] %v176_v2, 128  ;;  %300 = vxpose.xlu0.b32.cont [2/16] %v175_v3, 128  ;;  %v192_v10 = vld [vmem:[%s1095_s23 + $0xa8] sm:$0xff]  ;;  %v191_v11 = vld [vmem:[%s1095_s23 + $0xa0] sm:$0xff]  ;;  %v182_v36 = vld [vmem:[%s1095_s23 + $0x58] sm:$0xff]  ;;  %p909_p12 = pnand %p908_p8, %p1056_p9  ;;  %s913_s3 = scalar_lea.vmem %s912_s2, 32768 }
  0x32   : > { %v196_v12 = vld [vmem:[%s1095_s23 + $0xc8] sm:$0xff]  ;;  %v195_v13 = vld [vmem:[%s1095_s23 + $0xc0] sm:$0xff]  ;;  %v181_v37 = vld [vmem:[%s1095_s23 + $0x50] sm:$0xff]  ;;  %p914_p1 = scmp.lt.s32.totalorder %s1366_s25, %s912_s2  ;;  %p915_p3 = scmp.lt.s32.totalorder %s913_s3, %s907_s29 }
  0x33   : > { %v200_v14 = vld [vmem:[%s1095_s23 + $0xe8] sm:$0xff]  ;;  %v199_v15 = vld [vmem:[%s1095_s23 + $0xe0] sm:$0xff]  ;;  %v186_v38 = vld [vmem:[%s1095_s23 + $0x78] sm:$0xff]  ;;  %p910_p0 = pneg %p909_p12 }
  0x34   : > { %v204_v16 = vld [vmem:[%s1095_s23 + $0x108] sm:$0xff]  ;;  %v203_v17 = vld [vmem:[%s1095_s23 + $0x100] sm:$0xff]  ;;  %v185_v39 = vld [vmem:[%s1095_s23 + $0x70] sm:$0xff]  ;;  %p916_p5 = por %p915_p3, %p914_p1 }
  0x35   : > { %333 = vxpose.xlu1.b32.cont [3/16] %v180_v4, 128  ;;  %301 = vxpose.xlu0.b32.cont [3/16] %v179_v5, 128  ;;  %v208_v18 = vld [vmem:[%s1095_s23 + $0x128] sm:$0xff]  ;;  %v207_v19 = vld [vmem:[%s1095_s23 + $0x120] sm:$0xff]  ;;  %v190_v40 = vld [vmem:[%s1095_s23 + $0x98] sm:$0xff] }
  0x36   : > { %v212_v20 = vld [vmem:[%s1095_s23 + $0x148] sm:$0xff]  ;;  %v211_v21 = vld [vmem:[%s1095_s23 + $0x140] sm:$0xff]  ;;  %v189_v41 = vld [vmem:[%s1095_s23 + $0x90] sm:$0xff]  ;;  %p917_p6 = pnand %p916_p5, %p910_p0 }
  0x37   : > { %v216_v22 = vld [vmem:[%s1095_s23 + $0x168] sm:$0xff]  ;;  %v215_v23 = vld [vmem:[%s1095_s23 + $0x160] sm:$0xff]  ;;  %v194_v42 = vld [vmem:[%s1095_s23 + $0xb8] sm:$0xff] }
  0x38   : > { %v220_v24 = vld [vmem:[%s1095_s23 + $0x188] sm:$0xff]  ;;  %v219_v25 = vld [vmem:[%s1095_s23 + $0x180] sm:$0xff]  ;;  %v193_v43 = vld [vmem:[%s1095_s23 + $0xb0] sm:$0xff] }
  0x39   : > { %334 = vxpose.xlu1.b32.cont [4/16] %v184_v6, 128  ;;  %302 = vxpose.xlu0.b32.cont [4/16] %v183_v7, 128  ;;  %v224_v26 = vld [vmem:[%s1095_s23 + $0x1a8] sm:$0xff]  ;;  %v223_v27 = vld [vmem:[%s1095_s23 + $0x1a0] sm:$0xff]  ;;  %v198_v44 = vld [vmem:[%s1095_s23 + $0xd8] sm:$0xff] }
  0x3a   : > { %v228_v28 = vld [vmem:[%s1095_s23 + $0x1c8] sm:$0xff]  ;;  %v227_v29 = vld [vmem:[%s1095_s23 + $0x1c0] sm:$0xff]  ;;  %v197_v45 = vld [vmem:[%s1095_s23 + $0xd0] sm:$0xff] }
  0x3b   : > { %v232_v30 = vld [vmem:[%s1095_s23 + $0x1e8] sm:$0xff]  ;;  %v231_v31 = vld [vmem:[%s1095_s23 + $0x1e0] sm:$0xff]  ;;  %v202_v46 = vld [vmem:[%s1095_s23 + $0xf8] sm:$0xff] }
  0x3c   : > { %v201_v47 = vld [vmem:[%s1095_s23 + $0xf0] sm:$0xff]  ;;  %v206_v48 = vld [vmem:[%s1095_s23 + $0x118] sm:$0xff]  ;;  %v236_v2 = vld [vmem:[%s1095_s23 + $0x208] sm:$0xff] }
  0x3d   : > { %335 = vxpose.xlu1.b32.cont [5/16] %v188_v8, 128  ;;  %303 = vxpose.xlu0.b32.cont [5/16] %v187_v9, 128  ;;  %v205_v49 = vld [vmem:[%s1095_s23 + $0x110] sm:$0xff]  ;;  %v210_v50 = vld [vmem:[%s1095_s23 + $0x138] sm:$0xff]  ;;  %v235_v3 = vld [vmem:[%s1095_s23 + $0x200] sm:$0xff] }
  0x3e   : > { %v209_v51 = vld [vmem:[%s1095_s23 + $0x130] sm:$0xff]  ;;  %v214_v52 = vld [vmem:[%s1095_s23 + $0x158] sm:$0xff]  ;;  %v240_v6 = vld [vmem:[%s1095_s23 + $0x228] sm:$0xff] }
  0x3f   : > { %v213_v53 = vld [vmem:[%s1095_s23 + $0x150] sm:$0xff]  ;;  %v218_v54 = vld [vmem:[%s1095_s23 + $0x178] sm:$0xff]  ;;  %v239_v7 = vld [vmem:[%s1095_s23 + $0x220] sm:$0xff] }
  0x40   : > { %v217_v55 = vld [vmem:[%s1095_s23 + $0x170] sm:$0xff]  ;;  %v222_v56 = vld [vmem:[%s1095_s23 + $0x198] sm:$0xff] }
  0x41   : > { %336 = vxpose.xlu1.b32.cont [6/16] %v192_v10, 128  ;;  %304 = vxpose.xlu0.b32.cont [6/16] %v191_v11, 128  ;;  %v221_v57 = vld [vmem:[%s1095_s23 + $0x190] sm:$0xff]  ;;  %v226_v58 = vld [vmem:[%s1095_s23 + $0x1b8] sm:$0xff]  ;;  %v244_v10 = vld [vmem:[%s1095_s23 + $0x248] sm:$0xff] }
  0x42   : > { %v225_v59 = vld [vmem:[%s1095_s23 + $0x1b0] sm:$0xff]  ;;  %v230_v60 = vld [vmem:[%s1095_s23 + $0x1d8] sm:$0xff]  ;;  %v243_v11 = vld [vmem:[%s1095_s23 + $0x240] sm:$0xff] }
  0x43   : > { %v229_v61 = vld [vmem:[%s1095_s23 + $0x1d0] sm:$0xff]  ;;  %v234_v62 = vld [vmem:[%s1095_s23 + $0x1f8] sm:$0xff] }
  0x44   : > { %v233_v63 = vld [vmem:[%s1095_s23 + $0x1f0] sm:$0xff] }
  0x45   : > { %337 = vxpose.xlu1.b32.cont [7/16] %v196_v12, 128  ;;  %305 = vxpose.xlu0.b32.cont [7/16] %v195_v13, 128 }
  0x49   : > { %338 = vxpose.xlu1.b32.cont [8/16] %v200_v14, 128  ;;  %306 = vxpose.xlu0.b32.cont [8/16] %v199_v15, 128  ;;  %v248_v14 = vld [vmem:[%s1095_s23 + $0x268] sm:$0xff]  ;;  %v247_v15 = vld [vmem:[%s1095_s23 + $0x260] sm:$0xff] }
  0x4d   : > { %339 = vxpose.xlu1.b32.cont [9/16] %v204_v16, 128  ;;  %307 = vxpose.xlu0.b32.cont [9/16] %v203_v17, 128 }
  0x51   : > { %340 = vxpose.xlu1.b32.cont [10/16] %v208_v18, 128  ;;  %308 = vxpose.xlu0.b32.cont [10/16] %v207_v19, 128  ;;  %v252_v18 = vld [vmem:[%s1095_s23 + $0x288] sm:$0xff]  ;;  %v251_v19 = vld [vmem:[%s1095_s23 + $0x280] sm:$0xff] }
  0x55   : > { %341 = vxpose.xlu1.b32.cont [11/16] %v212_v20, 128  ;;  %309 = vxpose.xlu0.b32.cont [11/16] %v211_v21, 128 }
  0x59   : > { %342 = vxpose.xlu1.b32.cont [12/16] %v216_v22, 128  ;;  %310 = vxpose.xlu0.b32.cont [12/16] %v215_v23, 128  ;;  %v256_v22 = vld [vmem:[%s1095_s23 + $0x2a8] sm:$0xff]  ;;  %v255_v23 = vld [vmem:[%s1095_s23 + $0x2a0] sm:$0xff] }
  0x5d   : > { %343 = vxpose.xlu1.b32.cont [13/16] %v220_v24, 128  ;;  %311 = vxpose.xlu0.b32.cont [13/16] %v219_v25, 128 }
  0x61   : > { %344 = vxpose.xlu1.b32.cont [14/16] %v224_v26, 128  ;;  %312 = vxpose.xlu0.b32.cont [14/16] %v223_v27, 128  ;;  %v260_v26 = vld [vmem:[%s1095_s23 + $0x2c8] sm:$0xff]  ;;  %v259_v27 = vld [vmem:[%s1095_s23 + $0x2c0] sm:$0xff] }
  0x65   : > { %345 = vxpose.xlu1.b32.cont [15/16] %v228_v28, 128  ;;  %313 = vxpose.xlu0.b32.cont [15/16] %v227_v29, 128 }
  0x69   : > { %346 = vxpose.xlu1.b32.end [16/16] %v232_v30, 128  ;;  %314 = vxpose.xlu0.b32.end [16/16] %v231_v31, 128  ;;  %v264_v30 = vld [vmem:[%s1095_s23 + $0x2e8] sm:$0xff]  ;;  %v263_v31 = vld [vmem:[%s1095_s23 + $0x2e0] sm:$0xff] }
  0x6d   : > { %395 = vxpose.xlu1.b32.start [1/16] %v174_v32, 128  ;;  %363 = vxpose.xlu0.b32.start [1/16] %v173_v33, 128 }
  0x71   : > { %396 = vxpose.xlu1.b32.cont [2/16] %v178_v34, 128  ;;  %364 = vxpose.xlu0.b32.cont [2/16] %v177_v35, 128  ;;  %v268_v34 = vld [vmem:[%s1095_s23 + $0x308] sm:$0xff]  ;;  %v267_v35 = vld [vmem:[%s1095_s23 + $0x300] sm:$0xff] }
  0x75   : > { %397 = vxpose.xlu1.b32.cont [3/16] %v182_v36, 128  ;;  %365 = vxpose.xlu0.b32.cont [3/16] %v181_v37, 128 }
  0x79   : > { %398 = vxpose.xlu1.b32.cont [4/16] %v186_v38, 128  ;;  %366 = vxpose.xlu0.b32.cont [4/16] %v185_v39, 128  ;;  %v272_v38 = vld [vmem:[%s1095_s23 + $0x328] sm:$0xff]  ;;  %v271_v39 = vld [vmem:[%s1095_s23 + $0x320] sm:$0xff] }
  0x7d   : > { %399 = vxpose.xlu1.b32.cont [5/16] %v190_v40, 128  ;;  %367 = vxpose.xlu0.b32.cont [5/16] %v189_v41, 128 }
  0x81   : > { %400 = vxpose.xlu1.b32.cont [6/16] %v194_v42, 128  ;;  %368 = vxpose.xlu0.b32.cont [6/16] %v193_v43, 128  ;;  %v276_v42 = vld [vmem:[%s1095_s23 + $0x348] sm:$0xff]  ;;  %v275_v43 = vld [vmem:[%s1095_s23 + $0x340] sm:$0xff] }
  0x85   : > { %401 = vxpose.xlu1.b32.cont [7/16] %v198_v44, 128  ;;  %369 = vxpose.xlu0.b32.cont [7/16] %v197_v45, 128 }
  0x89   : > { %402 = vxpose.xlu1.b32.cont [8/16] %v202_v46, 128  ;;  %370 = vxpose.xlu0.b32.cont [8/16] %v201_v47, 128  ;;  %v280_v46 = vld [vmem:[%s1095_s23 + $0x368] sm:$0xff]  ;;  %v279_v47 = vld [vmem:[%s1095_s23 + $0x360] sm:$0xff] }
  0x8d   : > { %403 = vxpose.xlu1.b32.cont [9/16] %v206_v48, 128  ;;  %371 = vxpose.xlu0.b32.cont [9/16] %v205_v49, 128 }
  0x91   : > { %404 = vxpose.xlu1.b32.cont [10/16] %v210_v50, 128  ;;  %372 = vxpose.xlu0.b32.cont [10/16] %v209_v51, 128  ;;  %v284_v50 = vld [vmem:[%s1095_s23 + $0x388] sm:$0xff]  ;;  %v283_v51 = vld [vmem:[%s1095_s23 + $0x380] sm:$0xff] }
  0x95   : > { %405 = vxpose.xlu1.b32.cont [11/16] %v214_v52, 128  ;;  %373 = vxpose.xlu0.b32.cont [11/16] %v213_v53, 128 }
  0x99   : > { %406 = vxpose.xlu1.b32.cont [12/16] %v218_v54, 128  ;;  %374 = vxpose.xlu0.b32.cont [12/16] %v217_v55, 128  ;;  %v288_v54 = vld [vmem:[%s1095_s23 + $0x3a8] sm:$0xff]  ;;  %v287_v55 = vld [vmem:[%s1095_s23 + $0x3a0] sm:$0xff] }
  0x9d   : > { %407 = vxpose.xlu1.b32.cont [13/16] %v222_v56, 128  ;;  %375 = vxpose.xlu0.b32.cont [13/16] %v221_v57, 128 }
  0xa1   : > { %408 = vxpose.xlu1.b32.cont [14/16] %v226_v58, 128  ;;  %376 = vxpose.xlu0.b32.cont [14/16] %v225_v59, 128  ;;  %v292_v58 = vld [vmem:[%s1095_s23 + $0x3c8] sm:$0xff]  ;;  %v291_v59 = vld [vmem:[%s1095_s23 + $0x3c0] sm:$0xff] }
  0xa5   : > { %409 = vxpose.xlu1.b32.cont [15/16] %v230_v60, 128  ;;  %377 = vxpose.xlu0.b32.cont [15/16] %v229_v61, 128 }
  0xa9   : > { %410 = vxpose.xlu1.b32.end [16/16] %v234_v62, 128  ;;  %v347_v0 = vpop.trf.xlu1  ;;  %378 = vxpose.xlu0.b32.end [16/16] %v233_v63, 128  ;;  %v315_v1 = vpop.trf.xlu0  ;;  %v296_v62 = vld [vmem:[%s1095_s23 + $0x3e8] sm:$0xff]  ;;  %v295_v63 = vld [vmem:[%s1095_s23 + $0x3e0] sm:$0xff] }
  0xaa   : > { %587 = vst [vmem:[%s1167_s18 + $0x100] sm:$0xff] %v347_v0  ;;  %555 = vst [vmem:[%s1167_s18] sm:$0xff] %v315_v1 }
  0xad   : > { %459 = vxpose.xlu1.b32.start [1/16] %v236_v2, 128  ;;  %v348_v4 = vpop.trf.xlu1  ;;  %427 = vxpose.xlu0.b32.start [1/16] %v235_v3, 128  ;;  %v316_v5 = vpop.trf.xlu0  ;;  %v238_v2 = vld [vmem:[%s1095_s23 + $0x218] sm:$0xff]  ;;  %v237_v3 = vld [vmem:[%s1095_s23 + $0x210] sm:$0xff] }
  0xae   : > { %589 = vst [vmem:[%s1167_s18 + $0x110] sm:$0xff] %v348_v4  ;;  %557 = vst [vmem:[%s1167_s18 + $0x10] sm:$0xff] %v316_v5 }
  0xb1   : > { %460 = vxpose.xlu1.b32.cont [2/16] %v240_v6, 128  ;;  %v349_v8 = vpop.trf.xlu1  ;;  %428 = vxpose.xlu0.b32.cont [2/16] %v239_v7, 128  ;;  %v317_v9 = vpop.trf.xlu0  ;;  %v242_v6 = vld [vmem:[%s1095_s23 + $0x238] sm:$0xff]  ;;  %v241_v7 = vld [vmem:[%s1095_s23 + $0x230] sm:$0xff] }
  0xb2   : > { %591 = vst [vmem:[%s1167_s18 + $0x120] sm:$0xff] %v349_v8  ;;  %559 = vst [vmem:[%s1167_s18 + $0x20] sm:$0xff] %v317_v9 }
  0xb5   : > { %461 = vxpose.xlu1.b32.cont [3/16] %v244_v10, 128  ;;  %v350_v12 = vpop.trf.xlu1  ;;  %429 = vxpose.xlu0.b32.cont [3/16] %v243_v11, 128  ;;  %v318_v13 = vpop.trf.xlu0  ;;  %v246_v10 = vld [vmem:[%s1095_s23 + $0x258] sm:$0xff]  ;;  %v245_v11 = vld [vmem:[%s1095_s23 + $0x250] sm:$0xff] }
  0xb6   : > { %593 = vst [vmem:[%s1167_s18 + $0x130] sm:$0xff] %v350_v12  ;;  %561 = vst [vmem:[%s1167_s18 + $0x30] sm:$0xff] %v318_v13 }
  0xb9   : > { %462 = vxpose.xlu1.b32.cont [4/16] %v248_v14, 128  ;;  %v351_v16 = vpop.trf.xlu1  ;;  %430 = vxpose.xlu0.b32.cont [4/16] %v247_v15, 128  ;;  %v319_v17 = vpop.trf.xlu0  ;;  %v250_v14 = vld [vmem:[%s1095_s23 + $0x278] sm:$0xff]  ;;  %v249_v15 = vld [vmem:[%s1095_s23 + $0x270] sm:$0xff] }
  0xba   : > { %595 = vst [vmem:[%s1167_s18 + $0x140] sm:$0xff] %v351_v16  ;;  %563 = vst [vmem:[%s1167_s18 + $0x40] sm:$0xff] %v319_v17 }
  0xbd   : > { %463 = vxpose.xlu1.b32.cont [5/16] %v252_v18, 128  ;;  %v352_v20 = vpop.trf.xlu1  ;;  %431 = vxpose.xlu0.b32.cont [5/16] %v251_v19, 128  ;;  %v320_v21 = vpop.trf.xlu0  ;;  %v254_v18 = vld [vmem:[%s1095_s23 + $0x298] sm:$0xff]  ;;  %v253_v19 = vld [vmem:[%s1095_s23 + $0x290] sm:$0xff] }
  0xbe   : > { %597 = vst [vmem:[%s1167_s18 + $0x150] sm:$0xff] %v352_v20  ;;  %565 = vst [vmem:[%s1167_s18 + $0x50] sm:$0xff] %v320_v21 }
  0xc1   : > { %464 = vxpose.xlu1.b32.cont [6/16] %v256_v22, 128  ;;  %v353_v24 = vpop.trf.xlu1  ;;  %432 = vxpose.xlu0.b32.cont [6/16] %v255_v23, 128  ;;  %v321_v25 = vpop.trf.xlu0  ;;  %v258_v22 = vld [vmem:[%s1095_s23 + $0x2b8] sm:$0xff]  ;;  %v257_v23 = vld [vmem:[%s1095_s23 + $0x2b0] sm:$0xff] }
  0xc2   : > { %599 = vst [vmem:[%s1167_s18 + $0x160] sm:$0xff] %v353_v24  ;;  %567 = vst [vmem:[%s1167_s18 + $0x60] sm:$0xff] %v321_v25 }
  0xc5   : > { %465 = vxpose.xlu1.b32.cont [7/16] %v260_v26, 128  ;;  %v354_v28 = vpop.trf.xlu1  ;;  %433 = vxpose.xlu0.b32.cont [7/16] %v259_v27, 128  ;;  %v322_v29 = vpop.trf.xlu0  ;;  %v262_v26 = vld [vmem:[%s1095_s23 + $0x2d8] sm:$0xff]  ;;  %v261_v27 = vld [vmem:[%s1095_s23 + $0x2d0] sm:$0xff] }
  0xc6   : > { %601 = vst [vmem:[%s1167_s18 + $0x170] sm:$0xff] %v354_v28  ;;  %569 = vst [vmem:[%s1167_s18 + $0x70] sm:$0xff] %v322_v29 }
  0xc9   : > { %466 = vxpose.xlu1.b32.cont [8/16] %v264_v30, 128  ;;  %v355_v32 = vpop.trf.xlu1  ;;  %434 = vxpose.xlu0.b32.cont [8/16] %v263_v31, 128  ;;  %v323_v33 = vpop.trf.xlu0  ;;  %v266_v30 = vld [vmem:[%s1095_s23 + $0x2f8] sm:$0xff]  ;;  %v265_v31 = vld [vmem:[%s1095_s23 + $0x2f0] sm:$0xff] }
  0xca   : > { %603 = vst [vmem:[%s1167_s18 + $0x180] sm:$0xff] %v355_v32  ;;  %571 = vst [vmem:[%s1167_s18 + $0x80] sm:$0xff] %v323_v33 }
  0xcd   : > { %467 = vxpose.xlu1.b32.cont [9/16] %v268_v34, 128  ;;  %v356_v36 = vpop.trf.xlu1  ;;  %435 = vxpose.xlu0.b32.cont [9/16] %v267_v35, 128  ;;  %v324_v37 = vpop.trf.xlu0  ;;  %v270_v34 = vld [vmem:[%s1095_s23 + $0x318] sm:$0xff]  ;;  %v269_v35 = vld [vmem:[%s1095_s23 + $0x310] sm:$0xff] }
  0xce   : > { %605 = vst [vmem:[%s1167_s18 + $0x190] sm:$0xff] %v356_v36  ;;  %573 = vst [vmem:[%s1167_s18 + $0x90] sm:$0xff] %v324_v37 }
  0xd1   : > { %468 = vxpose.xlu1.b32.cont [10/16] %v272_v38, 128  ;;  %v357_v40 = vpop.trf.xlu1  ;;  %436 = vxpose.xlu0.b32.cont [10/16] %v271_v39, 128  ;;  %v325_v41 = vpop.trf.xlu0  ;;  %v274_v38 = vld [vmem:[%s1095_s23 + $0x338] sm:$0xff]  ;;  %v273_v39 = vld [vmem:[%s1095_s23 + $0x330] sm:$0xff] }
  0xd2   : > { %607 = vst [vmem:[%s1167_s18 + $0x1a0] sm:$0xff] %v357_v40  ;;  %575 = vst [vmem:[%s1167_s18 + $0xa0] sm:$0xff] %v325_v41 }
  0xd5   : > { %469 = vxpose.xlu1.b32.cont [11/16] %v276_v42, 128  ;;  %v358_v44 = vpop.trf.xlu1  ;;  %437 = vxpose.xlu0.b32.cont [11/16] %v275_v43, 128  ;;  %v326_v45 = vpop.trf.xlu0  ;;  %v278_v42 = vld [vmem:[%s1095_s23 + $0x358] sm:$0xff]  ;;  %v277_v43 = vld [vmem:[%s1095_s23 + $0x350] sm:$0xff] }
  0xd6   : > { %609 = vst [vmem:[%s1167_s18 + $0x1b0] sm:$0xff] %v358_v44  ;;  %577 = vst [vmem:[%s1167_s18 + $0xb0] sm:$0xff] %v326_v45 }
  0xd9   : > { %470 = vxpose.xlu1.b32.cont [12/16] %v280_v46, 128  ;;  %v359_v48 = vpop.trf.xlu1  ;;  %438 = vxpose.xlu0.b32.cont [12/16] %v279_v47, 128  ;;  %v327_v49 = vpop.trf.xlu0  ;;  %v282_v46 = vld [vmem:[%s1095_s23 + $0x378] sm:$0xff]  ;;  %v281_v47 = vld [vmem:[%s1095_s23 + $0x370] sm:$0xff] }
  0xda   : > { %611 = vst [vmem:[%s1167_s18 + $0x1c0] sm:$0xff] %v359_v48  ;;  %579 = vst [vmem:[%s1167_s18 + $0xc0] sm:$0xff] %v327_v49 }
  0xdd   : > { %471 = vxpose.xlu1.b32.cont [13/16] %v284_v50, 128  ;;  %v360_v52 = vpop.trf.xlu1  ;;  %439 = vxpose.xlu0.b32.cont [13/16] %v283_v51, 128  ;;  %v328_v53 = vpop.trf.xlu0  ;;  %v286_v50 = vld [vmem:[%s1095_s23 + $0x398] sm:$0xff]  ;;  %v285_v51 = vld [vmem:[%s1095_s23 + $0x390] sm:$0xff] }
  0xde   : > { %613 = vst [vmem:[%s1167_s18 + $0x1d0] sm:$0xff] %v360_v52  ;;  %581 = vst [vmem:[%s1167_s18 + $0xd0] sm:$0xff] %v328_v53 }
  0xe1   : > { %472 = vxpose.xlu1.b32.cont [14/16] %v288_v54, 128  ;;  %v361_v56 = vpop.trf.xlu1  ;;  %440 = vxpose.xlu0.b32.cont [14/16] %v287_v55, 128  ;;  %v329_v57 = vpop.trf.xlu0  ;;  %v290_v54 = vld [vmem:[%s1095_s23 + $0x3b8] sm:$0xff]  ;;  %v289_v55 = vld [vmem:[%s1095_s23 + $0x3b0] sm:$0xff] }
  0xe2   : > { %615 = vst [vmem:[%s1167_s18 + $0x1e0] sm:$0xff] %v361_v56  ;;  %583 = vst [vmem:[%s1167_s18 + $0xe0] sm:$0xff] %v329_v57 }
  0xe5   : > { %473 = vxpose.xlu1.b32.cont [15/16] %v292_v58, 128  ;;  %v362_v60 = vpop.trf.xlu1  ;;  %441 = vxpose.xlu0.b32.cont [15/16] %v291_v59, 128  ;;  %v330_v61 = vpop.trf.xlu0  ;;  %v294_v58 = vld [vmem:[%s1095_s23 + $0x3d8] sm:$0xff]  ;;  %v293_v59 = vld [vmem:[%s1095_s23 + $0x3d0] sm:$0xff] }
  0xe6   : > { %617 = vst [vmem:[%s1167_s18 + $0x1f0] sm:$0xff] %v362_v60  ;;  %585 = vst [vmem:[%s1167_s18 + $0xf0] sm:$0xff] %v330_v61 }
  0xe9   : > { %474 = vxpose.xlu1.b32.end [16/16] %v296_v62, 128  ;;  %v411_v0 = vpop.trf.xlu1  ;;  %442 = vxpose.xlu0.b32.end [16/16] %v295_v63, 128  ;;  %v379_v1 = vpop.trf.xlu0  ;;  %v298_v62 = vld [vmem:[%s1095_s23 + $0x3f8] sm:$0xff]  ;;  %v297_v63 = vld [vmem:[%s1095_s23 + $0x3f0] sm:$0xff] }
  0xea   : > { %651 = vst [vmem:[%s1167_s18 + $0x300] sm:$0xff] %v411_v0  ;;  %619 = vst [vmem:[%s1167_s18 + $0x200] sm:$0xff] %v379_v1 }
  0xed   : > { %523 = vxpose.xlu1.b32.start [1/16] %v238_v2, 128  ;;  %v412_v4 = vpop.trf.xlu1  ;;  %491 = vxpose.xlu0.b32.start [1/16] %v237_v3, 128  ;;  %v380_v5 = vpop.trf.xlu0 }
  0xee   : > { %653 = vst [vmem:[%s1167_s18 + $0x310] sm:$0xff] %v412_v4  ;;  %621 = vst [vmem:[%s1167_s18 + $0x210] sm:$0xff] %v380_v5 }
  0xf1   : > { %524 = vxpose.xlu1.b32.cont [2/16] %v242_v6, 128  ;;  %v413_v8 = vpop.trf.xlu1  ;;  %492 = vxpose.xlu0.b32.cont [2/16] %v241_v7, 128  ;;  %v381_v9 = vpop.trf.xlu0 }
  0xf2   : > { %655 = vst [vmem:[%s1167_s18 + $0x320] sm:$0xff] %v413_v8  ;;  %623 = vst [vmem:[%s1167_s18 + $0x220] sm:$0xff] %v381_v9 }
  0xf5   : > { %525 = vxpose.xlu1.b32.cont [3/16] %v246_v10, 128  ;;  %v414_v12 = vpop.trf.xlu1  ;;  %493 = vxpose.xlu0.b32.cont [3/16] %v245_v11, 128  ;;  %v382_v13 = vpop.trf.xlu0 }
  0xf6   : > { %657 = vst [vmem:[%s1167_s18 + $0x330] sm:$0xff] %v414_v12  ;;  %625 = vst [vmem:[%s1167_s18 + $0x230] sm:$0xff] %v382_v13 }
  0xf9   : > { %526 = vxpose.xlu1.b32.cont [4/16] %v250_v14, 128  ;;  %v415_v16 = vpop.trf.xlu1  ;;  %494 = vxpose.xlu0.b32.cont [4/16] %v249_v15, 128  ;;  %v383_v17 = vpop.trf.xlu0 }
  0xfa   : > { %659 = vst [vmem:[%s1167_s18 + $0x340] sm:$0xff] %v415_v16  ;;  %627 = vst [vmem:[%s1167_s18 + $0x240] sm:$0xff] %v383_v17 }
  0xfd   : > { %527 = vxpose.xlu1.b32.cont [5/16] %v254_v18, 128  ;;  %v416_v20 = vpop.trf.xlu1  ;;  %495 = vxpose.xlu0.b32.cont [5/16] %v253_v19, 128  ;;  %v384_v21 = vpop.trf.xlu0 }
  0xfe   : > { %661 = vst [vmem:[%s1167_s18 + $0x350] sm:$0xff] %v416_v20  ;;  %629 = vst [vmem:[%s1167_s18 + $0x250] sm:$0xff] %v384_v21 }
 0x101   : > { %528 = vxpose.xlu1.b32.cont [6/16] %v258_v22, 128  ;;  %v417_v24 = vpop.trf.xlu1  ;;  %496 = vxpose.xlu0.b32.cont [6/16] %v257_v23, 128  ;;  %v385_v25 = vpop.trf.xlu0 }
 0x102   : > { %663 = vst [vmem:[%s1167_s18 + $0x360] sm:$0xff] %v417_v24  ;;  %631 = vst [vmem:[%s1167_s18 + $0x260] sm:$0xff] %v385_v25 }
 0x105   : > { %529 = vxpose.xlu1.b32.cont [7/16] %v262_v26, 128  ;;  %v418_v28 = vpop.trf.xlu1  ;;  %497 = vxpose.xlu0.b32.cont [7/16] %v261_v27, 128  ;;  %v386_v29 = vpop.trf.xlu0 }
 0x106   : > { %665 = vst [vmem:[%s1167_s18 + $0x370] sm:$0xff] %v418_v28  ;;  %633 = vst [vmem:[%s1167_s18 + $0x270] sm:$0xff] %v386_v29 }
 0x109   : > { %530 = vxpose.xlu1.b32.cont [8/16] %v266_v30, 128  ;;  %v419_v32 = vpop.trf.xlu1  ;;  %498 = vxpose.xlu0.b32.cont [8/16] %v265_v31, 128  ;;  %v387_v33 = vpop.trf.xlu0 }
 0x10a   : > { %667 = vst [vmem:[%s1167_s18 + $0x380] sm:$0xff] %v419_v32  ;;  %635 = vst [vmem:[%s1167_s18 + $0x280] sm:$0xff] %v387_v33 }
 0x10d   : > { %531 = vxpose.xlu1.b32.cont [9/16] %v270_v34, 128  ;;  %v420_v36 = vpop.trf.xlu1  ;;  %499 = vxpose.xlu0.b32.cont [9/16] %v269_v35, 128  ;;  %v388_v37 = vpop.trf.xlu0 }
 0x10e   : > { %669 = vst [vmem:[%s1167_s18 + $0x390] sm:$0xff] %v420_v36  ;;  %637 = vst [vmem:[%s1167_s18 + $0x290] sm:$0xff] %v388_v37 }
 0x111   : > { %532 = vxpose.xlu1.b32.cont [10/16] %v274_v38, 128  ;;  %v421_v40 = vpop.trf.xlu1  ;;  %500 = vxpose.xlu0.b32.cont [10/16] %v273_v39, 128  ;;  %v389_v41 = vpop.trf.xlu0 }
 0x112   : > { %671 = vst [vmem:[%s1167_s18 + $0x3a0] sm:$0xff] %v421_v40  ;;  %639 = vst [vmem:[%s1167_s18 + $0x2a0] sm:$0xff] %v389_v41 }
 0x115   : > { %533 = vxpose.xlu1.b32.cont [11/16] %v278_v42, 128  ;;  %v422_v44 = vpop.trf.xlu1  ;;  %501 = vxpose.xlu0.b32.cont [11/16] %v277_v43, 128  ;;  %v390_v45 = vpop.trf.xlu0 }
 0x116   : > { %673 = vst [vmem:[%s1167_s18 + $0x3b0] sm:$0xff] %v422_v44  ;;  %641 = vst [vmem:[%s1167_s18 + $0x2b0] sm:$0xff] %v390_v45 }
 0x119   : > { %534 = vxpose.xlu1.b32.cont [12/16] %v282_v46, 128  ;;  %v423_v48 = vpop.trf.xlu1  ;;  %502 = vxpose.xlu0.b32.cont [12/16] %v281_v47, 128  ;;  %v391_v49 = vpop.trf.xlu0 }
 0x11a   : > { %675 = vst [vmem:[%s1167_s18 + $0x3c0] sm:$0xff] %v423_v48  ;;  %643 = vst [vmem:[%s1167_s18 + $0x2c0] sm:$0xff] %v391_v49 }
 0x11d   : > { %535 = vxpose.xlu1.b32.cont [13/16] %v286_v50, 128  ;;  %v424_v52 = vpop.trf.xlu1  ;;  %503 = vxpose.xlu0.b32.cont [13/16] %v285_v51, 128  ;;  %v392_v53 = vpop.trf.xlu0 }
 0x11e   : > { %677 = vst [vmem:[%s1167_s18 + $0x3d0] sm:$0xff] %v424_v52  ;;  %645 = vst [vmem:[%s1167_s18 + $0x2d0] sm:$0xff] %v392_v53 }
 0x121   : > { %536 = vxpose.xlu1.b32.cont [14/16] %v290_v54, 128  ;;  %v425_v56 = vpop.trf.xlu1  ;;  %504 = vxpose.xlu0.b32.cont [14/16] %v289_v55, 128  ;;  %v393_v57 = vpop.trf.xlu0 }
 0x122   : > { %679 = vst [vmem:[%s1167_s18 + $0x3e0] sm:$0xff] %v425_v56  ;;  %647 = vst [vmem:[%s1167_s18 + $0x2e0] sm:$0xff] %v393_v57 }
 0x125   : > { %537 = vxpose.xlu1.b32.cont [15/16] %v294_v58, 128  ;;  %v426_v60 = vpop.trf.xlu1  ;;  %505 = vxpose.xlu0.b32.cont [15/16] %v293_v59, 128  ;;  %v394_v61 = vpop.trf.xlu0 }
 0x126   : > { %681 = vst [vmem:[%s1167_s18 + $0x3f0] sm:$0xff] %v426_v60  ;;  %649 = vst [vmem:[%s1167_s18 + $0x2f0] sm:$0xff] %v394_v61 }
 0x129   : > { %538 = vxpose.xlu1.b32.end [16/16] %v298_v62, 128  ;;  %v475_v0 = vpop.trf.xlu1  ;;  %506 = vxpose.xlu0.b32.end [16/16] %v297_v63, 128  ;;  %v443_v1 = vpop.trf.xlu0 }
 0x12a   : > { %588 = vst [vmem:[%s1167_s18 + $0x108] sm:$0xff] %v475_v0  ;;  %556 = vst [vmem:[%s1167_s18 + $0x8] sm:$0xff] %v443_v1 }
 0x12d   : > { %v476_v2 = vpop.trf.xlu1  ;;  %v444_v3 = vpop.trf.xlu0 }
 0x12e   : > { %590 = vst [vmem:[%s1167_s18 + $0x118] sm:$0xff] %v476_v2  ;;  %558 = vst [vmem:[%s1167_s18 + $0x18] sm:$0xff] %v444_v3 }
 0x131   : > { %v477_v4 = vpop.trf.xlu1  ;;  %v445_v5 = vpop.trf.xlu0 }
 0x132   : > { %592 = vst [vmem:[%s1167_s18 + $0x128] sm:$0xff] %v477_v4  ;;  %560 = vst [vmem:[%s1167_s18 + $0x28] sm:$0xff] %v445_v5 }
 0x135   : > { %v478_v6 = vpop.trf.xlu1  ;;  %v446_v7 = vpop.trf.xlu0 }
 0x136   : > { %594 = vst [vmem:[%s1167_s18 + $0x138] sm:$0xff] %v478_v6  ;;  %562 = vst [vmem:[%s1167_s18 + $0x38] sm:$0xff] %v446_v7 }
 0x139   : > { %v479_v8 = vpop.trf.xlu1  ;;  %v447_v9 = vpop.trf.xlu0 }
 0x13a   : > { %596 = vst [vmem:[%s1167_s18 + $0x148] sm:$0xff] %v479_v8  ;;  %564 = vst [vmem:[%s1167_s18 + $0x48] sm:$0xff] %v447_v9 }
 0x13d   : > { %v480_v10 = vpop.trf.xlu1  ;;  %v448_v11 = vpop.trf.xlu0 }
 0x13e   : > { %598 = vst [vmem:[%s1167_s18 + $0x158] sm:$0xff] %v480_v10  ;;  %566 = vst [vmem:[%s1167_s18 + $0x58] sm:$0xff] %v448_v11 }
 0x141   : > { %v481_v12 = vpop.trf.xlu1  ;;  %v449_v13 = vpop.trf.xlu0 }
 0x142   : > { %600 = vst [vmem:[%s1167_s18 + $0x168] sm:$0xff] %v481_v12  ;;  %568 = vst [vmem:[%s1167_s18 + $0x68] sm:$0xff] %v449_v13 }
 0x145   : > { %v482_v14 = vpop.trf.xlu1  ;;  %v450_v15 = vpop.trf.xlu0 }
 0x146   : > { %602 = vst [vmem:[%s1167_s18 + $0x178] sm:$0xff] %v482_v14  ;;  %570 = vst [vmem:[%s1167_s18 + $0x78] sm:$0xff] %v450_v15 }
 0x149   : > { %v483_v16 = vpop.trf.xlu1  ;;  %v451_v17 = vpop.trf.xlu0 }
 0x14a   : > { %604 = vst [vmem:[%s1167_s18 + $0x188] sm:$0xff] %v483_v16  ;;  %572 = vst [vmem:[%s1167_s18 + $0x88] sm:$0xff] %v451_v17 }
 0x14d   : > { %v484_v18 = vpop.trf.xlu1  ;;  %v452_v19 = vpop.trf.xlu0 }
 0x14e   : > { %606 = vst [vmem:[%s1167_s18 + $0x198] sm:$0xff] %v484_v18  ;;  %574 = vst [vmem:[%s1167_s18 + $0x98] sm:$0xff] %v452_v19 }
 0x151   : > { %v485_v20 = vpop.trf.xlu1  ;;  %v453_v21 = vpop.trf.xlu0 }
 0x152   : > { %608 = vst [vmem:[%s1167_s18 + $0x1a8] sm:$0xff] %v485_v20  ;;  %576 = vst [vmem:[%s1167_s18 + $0xa8] sm:$0xff] %v453_v21 }
 0x155   : > { %v486_v22 = vpop.trf.xlu1  ;;  %v454_v23 = vpop.trf.xlu0 }
 0x156   : > { %610 = vst [vmem:[%s1167_s18 + $0x1b8] sm:$0xff] %v486_v22  ;;  %578 = vst [vmem:[%s1167_s18 + $0xb8] sm:$0xff] %v454_v23 }
 0x159   : > { %v487_v24 = vpop.trf.xlu1  ;;  %v455_v25 = vpop.trf.xlu0 }
 0x15a   : > { %612 = vst [vmem:[%s1167_s18 + $0x1c8] sm:$0xff] %v487_v24  ;;  %580 = vst [vmem:[%s1167_s18 + $0xc8] sm:$0xff] %v455_v25 }
 0x15d   : > { %v488_v26 = vpop.trf.xlu1  ;;  %v456_v27 = vpop.trf.xlu0 }
 0x15e   : > { %614 = vst [vmem:[%s1167_s18 + $0x1d8] sm:$0xff] %v488_v26  ;;  %582 = vst [vmem:[%s1167_s18 + $0xd8] sm:$0xff] %v456_v27 }
 0x161   : > { %v489_v28 = vpop.trf.xlu1  ;;  %v457_v29 = vpop.trf.xlu0 }
 0x162   : > { %616 = vst [vmem:[%s1167_s18 + $0x1e8] sm:$0xff] %v489_v28  ;;  %584 = vst [vmem:[%s1167_s18 + $0xe8] sm:$0xff] %v457_v29 }
 0x165   : > { %v490_v30 = vpop.trf.xlu1  ;;  %v458_v31 = vpop.trf.xlu0 }
 0x166   : > { %618 = vst [vmem:[%s1167_s18 + $0x1f8] sm:$0xff] %v490_v30  ;;  %586 = vst [vmem:[%s1167_s18 + $0xf8] sm:$0xff] %v458_v31 }
 0x169   : > { %v539_v32 = vpop.trf.xlu1  ;;  %v507_v33 = vpop.trf.xlu0 }
 0x16a   : > { %652 = vst [vmem:[%s1167_s18 + $0x308] sm:$0xff] %v539_v32  ;;  %620 = vst [vmem:[%s1167_s18 + $0x208] sm:$0xff] %v507_v33 }
 0x16d   : > { %v540_v34 = vpop.trf.xlu1  ;;  %v508_v35 = vpop.trf.xlu0 }
 0x16e   : > { %654 = vst [vmem:[%s1167_s18 + $0x318] sm:$0xff] %v540_v34  ;;  %622 = vst [vmem:[%s1167_s18 + $0x218] sm:$0xff] %v508_v35 }
 0x171   : > { %v541_v36 = vpop.trf.xlu1  ;;  %v509_v37 = vpop.trf.xlu0 }
 0x172   : > { %656 = vst [vmem:[%s1167_s18 + $0x328] sm:$0xff] %v541_v36  ;;  %624 = vst [vmem:[%s1167_s18 + $0x228] sm:$0xff] %v509_v37 }
 0x175   : > { %v542_v38 = vpop.trf.xlu1  ;;  %v510_v39 = vpop.trf.xlu0 }
 0x176   : > { %658 = vst [vmem:[%s1167_s18 + $0x338] sm:$0xff] %v542_v38  ;;  %626 = vst [vmem:[%s1167_s18 + $0x238] sm:$0xff] %v510_v39 }
 0x179   : > { %v543_v40 = vpop.trf.xlu1  ;;  %v511_v41 = vpop.trf.xlu0 }
 0x17a   : > { %660 = vst [vmem:[%s1167_s18 + $0x348] sm:$0xff] %v543_v40  ;;  %628 = vst [vmem:[%s1167_s18 + $0x248] sm:$0xff] %v511_v41 }
 0x17d   : > { %v544_v42 = vpop.trf.xlu1  ;;  %v512_v43 = vpop.trf.xlu0 }
 0x17e   : > { %662 = vst [vmem:[%s1167_s18 + $0x358] sm:$0xff] %v544_v42  ;;  %630 = vst [vmem:[%s1167_s18 + $0x258] sm:$0xff] %v512_v43 }
 0x181   : > { %v545_v44 = vpop.trf.xlu1  ;;  %v513_v45 = vpop.trf.xlu0 }
 0x182   : > { %664 = vst [vmem:[%s1167_s18 + $0x368] sm:$0xff] %v545_v44  ;;  %632 = vst [vmem:[%s1167_s18 + $0x268] sm:$0xff] %v513_v45 }
 0x185   : > { %v546_v46 = vpop.trf.xlu1  ;;  %v514_v47 = vpop.trf.xlu0 }
 0x186   : > { %666 = vst [vmem:[%s1167_s18 + $0x378] sm:$0xff] %v546_v46  ;;  %634 = vst [vmem:[%s1167_s18 + $0x278] sm:$0xff] %v514_v47 }
 0x189   : > { %v547_v48 = vpop.trf.xlu1  ;;  %v515_v49 = vpop.trf.xlu0 }
 0x18a   : > { %668 = vst [vmem:[%s1167_s18 + $0x388] sm:$0xff] %v547_v48  ;;  %636 = vst [vmem:[%s1167_s18 + $0x288] sm:$0xff] %v515_v49 }
 0x18d   : > { %v548_v50 = vpop.trf.xlu1  ;;  %v516_v51 = vpop.trf.xlu0 }
 0x18e   : > { %670 = vst [vmem:[%s1167_s18 + $0x398] sm:$0xff] %v548_v50  ;;  %638 = vst [vmem:[%s1167_s18 + $0x298] sm:$0xff] %v516_v51 }
 0x191   : > { %v549_v52 = vpop.trf.xlu1  ;;  %v517_v53 = vpop.trf.xlu0 }
 0x192   : > { %672 = vst [vmem:[%s1167_s18 + $0x3a8] sm:$0xff] %v549_v52  ;;  %640 = vst [vmem:[%s1167_s18 + $0x2a8] sm:$0xff] %v517_v53 }
 0x195   : > { %v550_v54 = vpop.trf.xlu1  ;;  %v518_v55 = vpop.trf.xlu0 }
 0x196   : > { %674 = vst [vmem:[%s1167_s18 + $0x3b8] sm:$0xff] %v550_v54  ;;  %642 = vst [vmem:[%s1167_s18 + $0x2b8] sm:$0xff] %v518_v55 }
 0x199   : > { %v551_v56 = vpop.trf.xlu1  ;;  %v519_v57 = vpop.trf.xlu0 }
 0x19a   : > { %676 = vst [vmem:[%s1167_s18 + $0x3c8] sm:$0xff] %v551_v56  ;;  %644 = vst [vmem:[%s1167_s18 + $0x2c8] sm:$0xff] %v519_v57 }
 0x19d   : > { %v552_v58 = vpop.trf.xlu1  ;;  %v520_v59 = vpop.trf.xlu0 }
 0x19e   : > { %678 = vst [vmem:[%s1167_s18 + $0x3d8] sm:$0xff] %v552_v58  ;;  %646 = vst [vmem:[%s1167_s18 + $0x2d8] sm:$0xff] %v520_v59 }
 0x1a1   : > { %v553_v60 = vpop.trf.xlu1  ;;  %v521_v61 = vpop.trf.xlu0 }
 0x1a2   : > { %680 = vst [vmem:[%s1167_s18 + $0x3e8] sm:$0xff] %v553_v60  ;;  %648 = vst [vmem:[%s1167_s18 + $0x2e8] sm:$0xff] %v521_v61 }
 0x1a5   : > { %v554_v62 = vpop.trf.xlu1  ;;  %v522_v63 = vpop.trf.xlu0 }
 0x1a6   : > { %682 = vst [vmem:[%s1167_s18 + $0x3f8] sm:$0xff] %v554_v62  ;;  %650 = vst [vmem:[%s1167_s18 + $0x2f8] sm:$0xff] %v522_v63 }
 0x1a7   : > { %920 = shalt.err (!%p917_p6)
}
 0x1a8   : > { %s921_s4 = scalar_lea.hbm %s1364_s28, 16384  ;;  %s925_s13 = scalar_lea.hbm %s1417_s1, 32768 }
 0x1a9   : > { %p922_p7 = scmp.ne.s32.totalorder %s1364_s28, %s921_s4  ;;  %p926_p13 = scmp.lt.s32.totalorder %s1364_s28, %s1417_s1 }
 0x1aa   : > { %p927_p2 = scmp.lt.s32.totalorder %s925_s13, %s921_s4 }
 0x1ab   : > { %p923_p10 = pnand %p922_p7, %p1056_p9 }
 0x1ac   : > { %p928_p8 = por %p927_p2, %p926_p13 }
 0x1ad   : > { %p924_p4 = pneg %p923_p10 }
 0x1af   : > { %p929_p12 = pnand %p928_p8, %p924_p4 }
 0x1b1   : > { %932 = shalt.err (!%p929_p12)
}
 0x1b2   : > { %s993_s22 = smov 256   ;;  %s994_s23 = smov 16  }
 0x1b3   : > { %815 = dma.vmem_to_hbm [thread:$0]  (%p1056_p9), %s1366_s25, 16384, %s1364_s28, %s684_s9, %s993_s22, %s993_s22, %s994_s23  }
 0x1b4 PF: > { %s717_s18 = sand.u32 1, %s967_s6   ;;  %p1423_p0 = scmp.ge.s32.totalorder %s987_s11, 2 }
 0x1b5   : > { %s718_s24 = scalar_lea.sflag [#allocation4], %s717_s18 }
 0x1b6   : > { %p822_p1 = pnand %p1423_p0, %p1063_p11 }
 0x1b8   : > { %p823_p3 = pneg %p822_p1 }
 0x1ba   : > { %962 = dma.done.wait (%p823_p3), %s718_s24, 16384  }
 0x1bb   : > { %964 = vsyncadd (%p823_p3), %s718_s24, 4294950912  ;;  %s17_s11 = sadd.s32 1, %s987_s11   ;;  %s1424_s6 = smov %s971_s7 }
 0x1bc   : > { %p14_p5 = scmp.ge.s32.totalorder %s17_s11, 4   ;;  %s1425_s7 = smov %s975_s8 }
 0x1bd   : > { %s1426_s8 = smov %s1061_s20  ;;  %s1427_s9 = smov %s983_s10 }
 0x1be   : > { %s1428_s10 = smov %s1430_s14  ;;  %16 = sbr.rel (!%p14_p5) target bundleno = 6 (0x6), region = 69 }
 0x1c3   :  { %723 = vsyncpa [#allocation3], 1 }
 0x1c4   :  { %725 = vsyncpa [#allocation3 + $0x1], 1 }
 0x1c5   :  { %726 = vsyncpa [#allocation4], 1 }
 0x1c6   :  { %728 = vsyncpa [#allocation4 + $0x1], 1 }

</bundles_post_ra>
